<compile_context>
chip_gen: v7x
topology: tpu7x:2x2x1
jax: 0.10.0
libtpu: 0.0.40
codegen_flags: <defaults>
</compile_context>

<pallas_src>
import jax
import jax.numpy as jnp
import numpy as np
from jax.experimental import pallas as pl
from jax.experimental.pallas import tpu as pltpu


def _gnn_embedder_kernel(src_ref, tgt_ref, ea_ref, xa_ref, w1_ref, w2_ref,
                         nroot_ref, batch_ref, invc_ref, pfc_ref,
                         out_ref, agg_ref):
    et = pl.program_id(0)
    n_et = pl.num_programs(0)

    Et = ea_ref.shape[0]
    N = xa_ref.shape[0]
    L = agg_ref.shape[1]
    G, D = out_ref.shape

    f32 = jnp.float32
    bf16 = jnp.bfloat16

    @pl.when(et == 0)
    def _():
        agg_ref[...] = jnp.zeros_like(agg_ref)

    # Edge network (bias folded into the matmul via the ones column of ea): one matmul.
    # h_ext lanes: [ tile(relu(ea@w1+b1), Fn) | 1s (B2 lanes) | 0s (pad lanes) ]
    h_ext = jnp.maximum(
        jnp.dot(ea_ref[...], w1_ref[...], preferred_element_type=f32), 0.0)   # [Et, Wext] f32

    # ONE [Et, N] iota reused for both gather and scatter one-hots.  Padded edges carry
    # an out-of-range sentinel index, so their rows are all-zero with no extra masking.
    iota_en = jax.lax.broadcasted_iota(jnp.int32, (Et, N), 1)
    src_oh = (iota_en == src_ref[...]).astype(bf16)                            # [Et, N]
    tgt_oh = (iota_en == tgt_ref[...]).astype(bf16)                            # [Et, N]

    # Lane-dense gather: rows of x_aug = [ repeat(x, L) | x@B2 | 0-pad ].
    gathered = jnp.dot(src_oh, xa_ref[...], preferred_element_type=f32)        # [Et, Wext] f32

    # Fused per-edge message: single deep-K matmul.
    #   msg[e,:] = x_src[e,:] @ reshape(h[e] @ w2 + b2, [Fn, L])
    # W2_ext = [ per-feature W2 blocks | I_L (B2 pass-through) | 0 rows ].
    combined = (gathered * h_ext).astype(bf16)                                 # cast at MXU boundary
    # msg rounded to bf16 before the f32 scatter accumulation (dominant, documented
    # error term; keeps the scatter contraction on the bf16 MXU path).
    msg = jnp.dot(combined, w2_ref[...], preferred_element_type=f32).astype(bf16)  # [Et, L]

    # Scatter-add to target nodes: transposed contraction over the edge axis
    # (no [N, Et] one-hot / transpose materialized).
    agg_ref[...] += jax.lax.dot_general(
        tgt_oh, msg, dimension_numbers=(((0,), (0,)), ((), ())),
        preferred_element_type=f32)                                            # [N, L]

    # ---- finalize on the last edge tile (finalize-only inputs read only here) ----
    @pl.when(et == n_et - 1)
    def _():
        # x @ root + bconv precomputed in f32 in the wrapper.
        node_out = jnp.maximum(agg_ref[...] + nroot_ref[...], 0.0)             # [N, L] f32

        graph_iota = jax.lax.broadcasted_iota(jnp.int32, (G, N), 0)
        b_oh = (graph_iota == batch_ref[...]).astype(bf16)                     # [G, N] exact 0/1
        pooled = jnp.dot(b_oh, node_out.astype(bf16),
                         preferred_element_type=f32) * invc_ref[...]           # [G, L]

        pfc = pfc_ref[...]                                                     # [L+1, D] bf16
        out_ref[...] = (
            jnp.dot(jnp.maximum(pooled, 0.0).astype(bf16), pfc[:L, :],
                    preferred_element_type=f32)
            + pfc[L:L + 1, :]
        )


def gnn_embedder_conv(x, edge_attr, edge_index, batch, params, num_graphs,
                      *, edge_tile=256):
    """Wrapper: parameter packing/widening, sentinel edge padding, pallas_call."""
    (w1, b1, w2, b2, root, bconv, wfc, bfc) = params
    N, Fn = x.shape
    E, Fe = edge_attr.shape
    L = w1.shape[1]
    D = wfc.shape[1]
    G = int(num_graphs)

    f32 = jnp.float32
    bf16 = jnp.bfloat16

    # Widths of the fused-message operand: [ Fn*L (product region) | L (B2 region) | pad ]
    Wraw = Fn * L + L
    Wext = -(-Wraw // 128) * 128
    pad_w = Wext - Wraw

    # Edge tile: sublane-aligned, capped so tiny graphs are not over-padded.
    Et = max(8, (int(edge_tile) // 8) * 8)
    Et = min(Et, -(-E // 8) * 8)
    num_tiles = -(-E // Et)
    E_pad = num_tiles * Et
    pad_e = E_pad - E

    # Sentinel index N for padded edges -> their one-hot rows are all zero, no masking.
    src_p = jnp.pad(edge_index[0].astype(jnp.int32), (0, pad_e),
                    constant_values=N).reshape(E_pad, 1)
    tgt_p = jnp.pad(edge_index[1].astype(jnp.int32), (0, pad_e),
                    constant_values=N).reshape(E_pad, 1)
    # TODO(synk): pack src/tgt into one [E_pad, 2] input to save a DMA descriptor per step.

    # Edge features with a ones column (folds the edge-net bias into its matmul).
    ea_aug = jnp.concatenate([edge_attr.astype(f32), jnp.ones((E, 1), f32)], axis=1)
    ea_p = jnp.pad(ea_aug, ((0, pad_e), (0, 0))).astype(bf16)                  # [E_pad, Fe+1]

    # Pre-widened node features: [ repeat(x, L) | x @ B2 | 0-pad ] (lane-dense gather).
    xf = x.astype(f32)
    B2 = b2.reshape(Fn, L).astype(f32)
    x_aug = jnp.concatenate(
        [jnp.repeat(xf, L, axis=1), xf @ B2, jnp.zeros((N, pad_w), f32)],
        axis=1).astype(bf16)                                                   # [N, Wext]

    # Extended edge-net weights: columns [ tile(w1, Fn) | 0 | 0 ], bias row [ tile(b1, Fn) | 1 | 0 ].
    w1_main = jnp.concatenate(
        [jnp.tile(w1.astype(f32), (1, Fn)), jnp.zeros((Fe, L), f32),
         jnp.zeros((Fe, pad_w), f32)], axis=1)
    w1_bias = jnp.concatenate(
        [jnp.tile(b1.reshape(1, L).astype(f32), (1, Fn)), jnp.ones((1, L), f32),
         jnp.zeros((1, pad_w), f32)], axis=1)
    w1_aug = jnp.concatenate([w1_main, w1_bias], axis=0).astype(bf16)          # [Fe+1, Wext]

    # Fused message weights: [ Fn blocks of w2 | I_L (B2 pass-through) | 0 rows ].
    W2_blocks = jnp.transpose(w2.astype(f32).reshape(L, Fn, L), (1, 0, 2)).reshape(Fn * L, L)
    W2_ext = jnp.concatenate(
        [W2_blocks, jnp.eye(L, dtype=f32), jnp.zeros((pad_w, L), f32)],
        axis=0).astype(bf16)                                                   # [Wext, L]

    # Root/self term precomputed once, in f32 (only needed at finalize).
    node_root = (xf @ root.astype(f32) + bconv.reshape(1, L).astype(f32)).astype(f32)  # [N, L]

    batch_row = batch.astype(jnp.int32).reshape(1, N)

    # 1 / (nodes per graph), precomputed outside the kernel (guards empty graphs).
    counts = jax.ops.segment_sum(jnp.ones((N,), f32), batch.astype(jnp.int32),
                                 num_segments=G)
    inv_counts = (1.0 / jnp.maximum(counts, 1.0)).reshape(G, 1).astype(f32)

    # Final Linear packed into one embed-width block.
    pFC = jnp.concatenate([wfc, bfc.reshape(1, D)], axis=0).astype(bf16)       # [L+1, D]

    # VMEM budget: only override the scoped default when the working set needs it.
    # TODO(synk): on v7x (64 MiB physical) additionally tile x_aug/agg over a node-block
    # grid axis and mark the constant-index resident inputs pl.Buffered(1) at large N.
    est = (2 * (Et * 4 * 2 + Et * (Fe + 1) * 2)                 # double-buffered edge tiles
           + N * Wext * 2 + (Fe + 1) * Wext * 2 + Wext * L * 2  # resident bf16 operands
           + N * L * 4 + N * 4 + G * 4 + (L + 1) * D * 2        # node_root/batch/counts/fc
           + N * L * 4 + G * D * 4)                             # agg scratch + output
    vmem_limit = None
    if est > 12 * 1024 * 1024:
        vmem_limit = min(int(est * 2), 96 * 1024 * 1024)

    # TODO(synk): for v7x add a leading "parallel" grid axis over edge super-tiles with
    # per-core [N, L] accumulators and a final merge to use both TensorCores; the edge
    # axis here is a reduction so it stays "arbitrary".
    out = pl.pallas_call(
        _gnn_embedder_kernel,
        out_shape=jax.ShapeDtypeStruct((G, D), f32),
        grid=(num_tiles,),
        in_specs=[
            pl.BlockSpec((Et, 1), lambda t: (t, 0)),              # src indices (sentinel-padded)
            pl.BlockSpec((Et, 1), lambda t: (t, 0)),              # tgt indices (sentinel-padded)
            pl.BlockSpec((Et, Fe + 1), lambda t: (t, 0)),         # edge features + ones column
            pl.BlockSpec((N, Wext), lambda t: (0, 0)),            # widened node features (resident)
            pl.BlockSpec((Fe + 1, Wext), lambda t: (0, 0)),       # extended edge-net weights
            pl.BlockSpec((Wext, L), lambda t: (0, 0)),            # fused message weights
            pl.BlockSpec((N, L), lambda t: (0, 0)),               # x@root + bconv (finalize only)
            pl.BlockSpec((1, N), lambda t: (0, 0)),               # graph assignment
            pl.BlockSpec((G, 1), lambda t: (0, 0)),               # 1/counts
            pl.BlockSpec((L + 1, D), lambda t: (0, 0)),           # packed fc params
        ],
        out_specs=pl.BlockSpec((G, D), lambda t: (0, 0)),
        scratch_shapes=[pltpu.VMEM((N, L), f32)],                 # node aggregation accumulator
        compiler_params=pltpu.CompilerParams(
            dimension_semantics=("arbitrary",),
            vmem_limit_bytes=vmem_limit),
    )(src_p, tgt_p, ea_p, x_aug, w1_aug, W2_ext, node_root, batch_row,
      inv_counts, pFC)
    return out


def reference_forward(x, edge_attr, edge_index, batch, params, num_graphs):
    """Pure-JAX f32 reference of the PyTorch forward (for correctness check)."""
    (w1, b1, w2, b2, root, bconv, wfc, bfc) = params
    N, Fn = x.shape
    L = w1.shape[1]
    src, tgt = edge_index[0], edge_index[1]

    h = jax.nn.relu(edge_attr @ w1 + b1[0])
    w_edge = (h @ w2 + b2[0]).reshape(-1, Fn, L)
    x_src = x[src]
    msg = jnp.einsum("ef,efl->el", x_src, w_edge)
    agg = jax.ops.segment_sum(msg, tgt, num_segments=N)
    node_out = jax.nn.relu(agg + x @ root + bconv[0])
    pool_sum = jax.ops.segment_sum(node_out, batch, num_segments=num_graphs)
    counts = jax.ops.segment_sum(jnp.ones((N,), jnp.float32), batch,
                                 num_segments=num_graphs)
    pooled = pool_sum / counts[:, None]
    return jax.nn.relu(pooled) @ wfc + bfc[0]


if __name__ == "__main__":
    # Small, module-consistent shapes
    num_node_features = 4     # Fn
    num_edge_features = 6     # Fe
    latent_dim = 32           # L
    embed_dim = 8             # D
    N = 16                    # total nodes (2 graphs x 8 nodes)
    E = 30                    # total edges (15 per graph; not a tile multiple -> pads)
    G = 2                     # graphs in the batch

    key = jax.random.PRNGKey(0)
    ks = jax.random.split(key, 12)

    # Deterministic synthetic parameters (module __init__ shapes)
    w1 = 0.1 * jax.random.normal(ks[0], (num_edge_features, latent_dim), jnp.float32)
    b1 = 0.1 * jax.random.normal(ks[1], (1, latent_dim), jnp.float32)
    w2 = 0.1 * jax.random.normal(ks[2], (latent_dim, num_node_features * latent_dim), jnp.float32)
    b2 = 0.1 * jax.random.normal(ks[3], (1, num_node_features * latent_dim), jnp.float32)
    root = 0.1 * jax.random.normal(ks[4], (num_node_features, latent_dim), jnp.float32)
    bconv = 0.1 * jax.random.normal(ks[5], (1, latent_dim), jnp.float32)
    wfc = 0.1 * jax.random.normal(ks[6], (latent_dim, embed_dim), jnp.float32)
    bfc = 0.1 * jax.random.normal(ks[7], (1, embed_dim), jnp.float32)
    params = (w1, b1, w2, b2, root, bconv, wfc, bfc)

    # Deterministic synthetic graph batch
    x = jax.random.normal(ks[8], (N, num_node_features), jnp.float32)
    edge_attr = jax.random.normal(ks[9], (E, num_edge_features), jnp.float32)
    src0 = jax.random.randint(ks[10], (E // 2,), 0, 8)           # graph 0 nodes 0..7
    tgt0 = jax.random.randint(ks[11], (E // 2,), 0, 8)
    src1 = src0 + 8                                              # graph 1 nodes 8..15
    tgt1 = tgt0 + 8
    edge_index = jnp.stack([jnp.concatenate([src0, src1]),
                            jnp.concatenate([tgt0, tgt1])]).astype(jnp.int32)
    batch = jnp.concatenate([jnp.zeros((8,), jnp.int32),
                             jnp.ones((8,), jnp.int32)])

    ref = reference_forward(x, edge_attr, edge_index, batch, params, G)
    ref = jax.block_until_ready(ref)

    # edge_tile=16 -> 2-step edge-reduction grid + sentinel-padded edges (tiled path)
    out_tiled = gnn_embedder_conv(x, edge_attr, edge_index, batch, params, G,
                                  edge_tile=16)
    out_tiled = jax.block_until_ready(out_tiled)

    # default edge_tile -> single-tile path (also sentinel-padded)
    out_single = gnn_embedder_conv(x, edge_attr, edge_index, batch, params, G)
    out_single = jax.block_until_ready(out_single)

    # Kernel feeds the MXU bf16 operands (f32 accumulation), so tolerance is sized
    # for bf16 rounding; observed error is ~1e-3 at these magnitudes.
    ok = (np.allclose(np.asarray(out_tiled), np.asarray(ref), rtol=2e-2, atol=2e-2) and
          np.allclose(np.asarray(out_single), np.asarray(ref), rtol=2e-2, atol=2e-2))
    if not ok:
        raise AssertionError("Pallas kernel output does not match reference")

    print("KERNEL_OK")
</pallas_src>

<mosaic_0001>
module attributes {stable_mosaic.version = 11 : i64} {
  func.func @_gnn_embedder_kernel(%arg0: i32, %arg1: memref<16x1xi32, #tpu.memory_space<vmem>>, %arg2: memref<16x1xi32, #tpu.memory_space<vmem>>, %arg3: memref<16x7xbf16, #tpu.memory_space<vmem>>, %arg4: memref<16x256xbf16, #tpu.memory_space<vmem>>, %arg5: memref<7x256xbf16, #tpu.memory_space<vmem>>, %arg6: memref<256x32xbf16, #tpu.memory_space<vmem>>, %arg7: memref<16x32xf32, #tpu.memory_space<vmem>>, %arg8: memref<1x16xi32, #tpu.memory_space<vmem>>, %arg9: memref<2x1xf32, #tpu.memory_space<vmem>>, %arg10: memref<33x8xbf16, #tpu.memory_space<vmem>>, %arg11: memref<2x8xf32, #tpu.memory_space<vmem>>, %arg12: memref<16x32xf32, #tpu.memory_space<vmem>>) attributes {dimension_semantics = [#tpu.dimension_semantics<arbitrary>], iteration_bounds = array<i64: 2>, scalar_prefetch = 0 : i64, scratch_operands = 1 : i64, tpu.core_type = #tpu.core_type<tc>, window_params = [{transform_indices = @transform_0, window_bounds = array<i64: 16, 1>}, {transform_indices = @transform_1, window_bounds = array<i64: 16, 1>}, {transform_indices = @transform_2, window_bounds = array<i64: 16, 7>}, {pipeline_mode = #tpu.pipeline_mode<synchronous>, transform_indices = @transform_3, window_bounds = array<i64: 16, 256>}, {pipeline_mode = #tpu.pipeline_mode<synchronous>, transform_indices = @transform_4, window_bounds = array<i64: 7, 256>}, {pipeline_mode = #tpu.pipeline_mode<synchronous>, transform_indices = @transform_5, window_bounds = array<i64: 256, 32>}, {pipeline_mode = #tpu.pipeline_mode<synchronous>, transform_indices = @transform_6, window_bounds = array<i64: 16, 32>}, {pipeline_mode = #tpu.pipeline_mode<synchronous>, transform_indices = @transform_7, window_bounds = array<i64: 1, 16>}, {pipeline_mode = #tpu.pipeline_mode<synchronous>, transform_indices = @transform_8, window_bounds = array<i64: 2, 1>}, {pipeline_mode = #tpu.pipeline_mode<synchronous>, transform_indices = @transform_9, window_bounds = array<i64: 33, 8>}, {pipeline_mode = #tpu.pipeline_mode<synchronous>, transform_indices = @transform_10, window_bounds = array<i64: 2, 8>}]} {
    %c0_i32 = arith.constant 0 : i32
    %0 = arith.cmpi eq, %arg0, %c0_i32 : i32
    %1 = arith.extui %0 : i1 to i32
    %c0_i32_0 = arith.constant 0 : i32
    %2 = arith.cmpi ne, %1, %c0_i32_0 : i32
    scf.if %2 {
      %cst_21 = arith.constant 0.000000e+00 : f32
      %35 = vector.broadcast %cst_21 : f32 to vector<16x32xf32>
      %c0_22 = arith.constant 0 : index
      %c0_23 = arith.constant 0 : index
      %36 = vector.load %arg12[%c0_22, %c0_23] : memref<16x32xf32, #tpu.memory_space<vmem>>, vector<16x32xf32>
      tpu.vector_store %arg12[%c0_22, %c0_23], %35 {strides = array<i32>} : memref<16x32xf32, #tpu.memory_space<vmem>>, vector<16x32xf32>,
    } else {
    }
    %c0 = arith.constant 0 : index
    %c0_1 = arith.constant 0 : index
    %3 = vector.load %arg3[%c0, %c0_1] : memref<16x7xbf16, #tpu.memory_space<vmem>>, vector<16x7xbf16>
    %c0_2 = arith.constant 0 : index
    %c0_3 = arith.constant 0 : index
    %4 = vector.load %arg5[%c0_2, %c0_3] : memref<7x256xbf16, #tpu.memory_space<vmem>>, vector<7x256xbf16>
    %cst = arith.constant dense<0.000000e+00> : vector<16x256xf32>
    %5 = tpu.matmul %3, %4, %cst {dimension_numbers = #tpu.dot_dimension_numbers<[1], [0], [0], [1], [0, 0, 1, 1], [], []>} : vector<16x7xbf16>, vector<7x256xbf16>, vector<16x256xf32> -> vector<16x256xf32>
    %cst_4 = arith.constant 0.000000e+00 : f32
    %6 = vector.broadcast %cst_4 : f32 to vector<16x256xf32>
    %7 = arith.maximumf %5, %6 : vector<16x256xf32>
    %8 = tpu.iota {dimensions = array<i32: 1>} : vector<16x16xi32>
    %c0_5 = arith.constant 0 : index
    %c0_6 = arith.constant 0 : index
    %9 = vector.load %arg1[%c0_5, %c0_6] : memref<16x1xi32, #tpu.memory_space<vmem>>, vector<16x1xi32>
    %10 = vector.broadcast %9 : vector<16x1xi32> to vector<16x16xi32>
    %11 = arith.cmpi eq, %8, %10 : vector<16x16xi32>
    %12 = arith.extui %11 : vector<16x16xi1> to vector<16x16xi32>
    %13 = arith.sitofp %12 : vector<16x16xi32> to vector<16x16xf32>
    %14 = arith.truncf %13 : vector<16x16xf32> to vector<16x16xbf16>
    %c0_7 = arith.constant 0 : index
    %c0_8 = arith.constant 0 : index
    %15 = vector.load %arg2[%c0_7, %c0_8] : memref<16x1xi32, #tpu.memory_space<vmem>>, vector<16x1xi32>
    %16 = vector.broadcast %15 : vector<16x1xi32> to vector<16x16xi32>
    %17 = arith.cmpi eq, %8, %16 : vector<16x16xi32>
    %18 = arith.extui %17 : vector<16x16xi1> to vector<16x16xi32>
    %19 = arith.sitofp %18 : vector<16x16xi32> to vector<16x16xf32>
    %20 = arith.truncf %19 : vector<16x16xf32> to vector<16x16xbf16>
    %c0_9 = arith.constant 0 : index
    %c0_10 = arith.constant 0 : index
    %21 = vector.load %arg4[%c0_9, %c0_10] : memref<16x256xbf16, #tpu.memory_space<vmem>>, vector<16x256xbf16>
    %cst_11 = arith.constant dense<0.000000e+00> : vector<16x256xf32>
    %22 = tpu.matmul %14, %21, %cst_11 {dimension_numbers = #tpu.dot_dimension_numbers<[1], [0], [0], [1], [0, 0, 1, 1], [], []>} : vector<16x16xbf16>, vector<16x256xbf16>, vector<16x256xf32> -> vector<16x256xf32>
    %23 = arith.mulf %22, %7 : vector<16x256xf32>
    %24 = arith.truncf %23 : vector<16x256xf32> to vector<16x256xbf16>
    %c0_12 = arith.constant 0 : index
    %c0_13 = arith.constant 0 : index
    %25 = vector.load %arg6[%c0_12, %c0_13] : memref<256x32xbf16, #tpu.memory_space<vmem>>, vector<256x32xbf16>
    %cst_14 = arith.constant dense<0.000000e+00> : vector<16x32xf32>
    %26 = tpu.matmul %24, %25, %cst_14 {dimension_numbers = #tpu.dot_dimension_numbers<[1], [0], [0], [1], [0, 0, 1, 1], [], []>} : vector<16x256xbf16>, vector<256x32xbf16>, vector<16x32xf32> -> vector<16x32xf32>
    %27 = arith.truncf %26 : vector<16x32xf32> to vector<16x32xbf16>
    %c0_15 = arith.constant 0 : index
    %c0_16 = arith.constant 0 : index
    %28 = vector.load %arg12[%c0_15, %c0_16] : memref<16x32xf32, #tpu.memory_space<vmem>>, vector<16x32xf32>
    %cst_17 = arith.constant dense<0.000000e+00> : vector<16x32xf32>
    %29 = tpu.matmul %20, %27, %cst_17 {dimension_numbers = #tpu.dot_dimension_numbers<[0], [0], [1], [1], [0, 1, 1, 1], [], []>} : vector<16x16xbf16>, vector<16x32xbf16>, vector<16x32xf32> -> vector<16x32xf32>
    %30 = arith.addf %28, %29 : vector<16x32xf32>
    %c0_18 = arith.constant 0 : index
    %c0_19 = arith.constant 0 : index
    %31 = vector.load %arg12[%c0_18, %c0_19] : memref<16x32xf32, #tpu.memory_space<vmem>>, vector<16x32xf32>
    tpu.vector_store %arg12[%c0_18, %c0_19], %30 {strides = array<i32>} : memref<16x32xf32, #tpu.memory_space<vmem>>, vector<16x32xf32>,
    %c1_i32 = arith.constant 1 : i32
    %32 = arith.cmpi eq, %arg0, %c1_i32 : i32
    %33 = arith.extui %32 : i1 to i32
    %c0_i32_20 = arith.constant 0 : i32
    %34 = arith.cmpi ne, %33, %c0_i32_20 : i32
    scf.if %34 {
      %c0_21 = arith.constant 0 : index
      %c0_22 = arith.constant 0 : index
      %35 = vector.load %arg12[%c0_21, %c0_22] : memref<16x32xf32, #tpu.memory_space<vmem>>, vector<16x32xf32>
      %c0_23 = arith.constant 0 : index
      %c0_24 = arith.constant 0 : index
      %36 = vector.load %arg7[%c0_23, %c0_24] : memref<16x32xf32, #tpu.memory_space<vmem>>, vector<16x32xf32>
      %37 = arith.addf %35, %36 : vector<16x32xf32>
      %cst_25 = arith.constant 0.000000e+00 : f32
      %38 = vector.broadcast %cst_25 : f32 to vector<16x32xf32>
      %39 = arith.maximumf %37, %38 : vector<16x32xf32>
      %40 = tpu.iota {dimensions = array<i32: 0>} : vector<2x16xi32>
      %c0_26 = arith.constant 0 : index
      %c0_27 = arith.constant 0 : index
      %41 = vector.load %arg8[%c0_26, %c0_27] : memref<1x16xi32, #tpu.memory_space<vmem>>, vector<1x16xi32>
      %42 = vector.broadcast %41 : vector<1x16xi32> to vector<2x16xi32>
      %43 = arith.cmpi eq, %40, %42 : vector<2x16xi32>
      %44 = arith.extui %43 : vector<2x16xi1> to vector<2x16xi32>
      %45 = arith.sitofp %44 : vector<2x16xi32> to vector<2x16xf32>
      %46 = arith.truncf %45 : vector<2x16xf32> to vector<2x16xbf16>
      %47 = arith.truncf %39 : vector<16x32xf32> to vector<16x32xbf16>
      %cst_28 = arith.constant dense<0.000000e+00> : vector<2x32xf32>
      %48 = tpu.matmul %46, %47, %cst_28 {dimension_numbers = #tpu.dot_dimension_numbers<[1], [0], [0], [1], [0, 0, 1, 1], [], []>} : vector<2x16xbf16>, vector<16x32xbf16>, vector<2x32xf32> -> vector<2x32xf32>
      %c0_29 = arith.constant 0 : index
      %c0_30 = arith.constant 0 : index
      %49 = vector.load %arg9[%c0_29, %c0_30] : memref<2x1xf32, #tpu.memory_space<vmem>>, vector<2x1xf32>
      %50 = vector.broadcast %49 : vector<2x1xf32> to vector<2x32xf32>
      %51 = arith.mulf %48, %50 : vector<2x32xf32>
      %c0_31 = arith.constant 0 : index
      %c0_32 = arith.constant 0 : index
      %52 = vector.load %arg10[%c0_31, %c0_32] : memref<33x8xbf16, #tpu.memory_space<vmem>>, vector<33x8xbf16>
      %cst_33 = arith.constant 0.000000e+00 : f32
      %53 = vector.broadcast %cst_33 : f32 to vector<2x32xf32>
      %54 = arith.maximumf %51, %53 : vector<2x32xf32>
      %55 = arith.truncf %54 : vector<2x32xf32> to vector<2x32xbf16>
      %56 = vector.extract_strided_slice %52 {offsets = [0, 0], sizes = [32, 8], strides = [1, 1]} : vector<33x8xbf16> to vector<32x8xbf16>
      %cst_34 = arith.constant dense<0.000000e+00> : vector<2x8xf32>
      %57 = tpu.matmul %55, %56, %cst_34 {dimension_numbers = #tpu.dot_dimension_numbers<[1], [0], [0], [1], [0, 0, 1, 1], [], []>} : vector<2x32xbf16>, vector<32x8xbf16>, vector<2x8xf32> -> vector<2x8xf32>
      %58 = vector.extract_strided_slice %52 {offsets = [32, 0], sizes = [1, 8], strides = [1, 1]} : vector<33x8xbf16> to vector<1x8xbf16>
      %59 = arith.extf %58 : vector<1x8xbf16> to vector<1x8xf32>
      %60 = vector.broadcast %59 : vector<1x8xf32> to vector<2x8xf32>
      %61 = arith.addf %57, %60 : vector<2x8xf32>
      %c0_35 = arith.constant 0 : index
      %c0_36 = arith.constant 0 : index
      %62 = vector.load %arg11[%c0_35, %c0_36] : memref<2x8xf32, #tpu.memory_space<vmem>>, vector<2x8xf32>
      tpu.vector_store %arg11[%c0_35, %c0_36], %61 {strides = array<i32>} : memref<2x8xf32, #tpu.memory_space<vmem>>, vector<2x8xf32>,
    } else {
    }
    return
  }
  func.func @transform_0(%arg0: i32) -> (i32, i32) {
    %c0_i32 = arith.constant 0 : i32
    %c0_i32_0 = arith.constant 0 : i32
    return %arg0, %c0_i32 : i32, i32
  }
  func.func @transform_1(%arg0: i32) -> (i32, i32) {
    %c0_i32 = arith.constant 0 : i32
    %c0_i32_0 = arith.constant 0 : i32
    return %arg0, %c0_i32 : i32, i32
  }
  func.func @transform_2(%arg0: i32) -> (i32, i32) {
    %c0_i32 = arith.constant 0 : i32
    %c0_i32_0 = arith.constant 0 : i32
    return %arg0, %c0_i32 : i32, i32
  }
  func.func @transform_3(%arg0: i32) -> (i32, i32) {
    %c0_i32 = arith.constant 0 : i32
    %c0_i32_0 = arith.constant 0 : i32
    %c0_i32_1 = arith.constant 0 : i32
    return %c0_i32, %c0_i32_0 : i32, i32
  }
  func.func @transform_4(%arg0: i32) -> (i32, i32) {
    %c0_i32 = arith.constant 0 : i32
    %c0_i32_0 = arith.constant 0 : i32
    %c0_i32_1 = arith.constant 0 : i32
    return %c0_i32, %c0_i32_0 : i32, i32
  }
  func.func @transform_5(%arg0: i32) -> (i32, i32) {
    %c0_i32 = arith.constant 0 : i32
    %c0_i32_0 = arith.constant 0 : i32
    %c0_i32_1 = arith.constant 0 : i32
    return %c0_i32, %c0_i32_0 : i32, i32
  }
  func.func @transform_6(%arg0: i32) -> (i32, i32) {
    %c0_i32 = arith.constant 0 : i32
    %c0_i32_0 = arith.constant 0 : i32
    %c0_i32_1 = arith.constant 0 : i32
    return %c0_i32, %c0_i32_0 : i32, i32
  }
  func.func @transform_7(%arg0: i32) -> (i32, i32) {
    %c0_i32 = arith.constant 0 : i32
    %c0_i32_0 = arith.constant 0 : i32
    %c0_i32_1 = arith.constant 0 : i32
    return %c0_i32, %c0_i32_0 : i32, i32
  }
  func.func @transform_8(%arg0: i32) -> (i32, i32) {
    %c0_i32 = arith.constant 0 : i32
    %c0_i32_0 = arith.constant 0 : i32
    %c0_i32_1 = arith.constant 0 : i32
    return %c0_i32, %c0_i32_0 : i32, i32
  }
  func.func @transform_9(%arg0: i32) -> (i32, i32) {
    %c0_i32 = arith.constant 0 : i32
    %c0_i32_0 = arith.constant 0 : i32
    %c0_i32_1 = arith.constant 0 : i32
    return %c0_i32, %c0_i32_0 : i32, i32
  }
  func.func @transform_10(%arg0: i32) -> (i32, i32) {
    %c0_i32 = arith.constant 0 : i32
    %c0_i32_0 = arith.constant 0 : i32
    %c0_i32_1 = arith.constant 0 : i32
    return %c0_i32, %c0_i32_0 : i32, i32
  }
}

</mosaic_0001>

<bundles_post_ra>
// kernel: tpu_custom_call.1
= control target key start
LH: loop header
LB: loop body
LE: loop exit
PB: predicated region body
PF: predicated region fallthrough
CT: control target
= control target key end

     0   :  { %15 = vsyncpa [#allocation4], 0  ;;  %s1272_s13 = smov 0   ;;  %s1416_s0 = inlined_call_operand.vmem [shape: s32[32,1], index: 0, kind: input, shape index: {}]   ;;  %s1417_s1 = inlined_call_operand.vmem [shape: s32[32,1], index: 1, kind: input, shape index: {}]   ;;  %s1418_s2 = inlined_call_operand.vmem [shape: bf16[32,7], index: 2, kind: input, shape index: {}]   ;;  %s1419_s3 = inlined_call_operand.vmem [shape: bf16[16,256], index: 3, kind: input, shape index: {}]   ;;  %s1420_s4 = inlined_call_operand.vmem [shape: bf16[7,256], index: 4, kind: input, shape index: {}]   ;;  %s1421_s5 = inlined_call_operand.vmem [shape: bf16[256,32], index: 5, kind: input, shape index: {}]   ;;  %s1422_s6 = inlined_call_operand.vmem [shape: f32[16,32], index: 6, kind: input, shape index: {}]   ;;  %s1423_s7 = inlined_call_operand.vmem [shape: s32[1,16], index: 7, kind: input, shape index: {}]   ;;  %s1424_s8 = inlined_call_operand.vmem [shape: f32[2,1], index: 8, kind: input, shape index: {}]   ;;  %s1425_s9 = inlined_call_operand.vmem [shape: bf16[33,8], index: 9, kind: input, shape index: {}]   ;;  %s1426_s10 = inlined_call_operand.hbm [shape: f32[2,8], index: 10, kind: output, shape index: {}]  }
   0x1 LB: > { %s1278_s14 = sadd.s32 4294967295, %s1206_s13   ;;  %p1024_p0 = scmp.ge.s32.totalorder %s1206_s13, 1  ;;  %s1206_s13 = sphi %s1272_s13, %s21_s13  }
   0x2   : > { %p331_p1 = scmp.lt.s32.totalorder %s1206_s13, 3 }
   0x4   : > { %p332_p2 = pnand %p1024_p0, %p331_p1 }
   0x5   : > { %s1025_s15 = sshll.u32 (!%p332_p2), %s1278_s14, 1  ;;  %p1031_p4 = scmp.ne.s32.totalorder (!%p332_p2), %s1278_s14, 0 }
   0x6   : > { %335 = sbr.rel (%p332_p2) target bundleno = 1291 (0x50b), region = 60  ;;  %p375_p3 = scmp.lt.s32.totalorder (!%p332_p2), %s1025_s15, 3 }
   0xd   : > { %s1428_s15 = smov (!%p375_p3, %s1025_s15), 3  ;;  %396 = sbr.rel (%p1031_p4) target bundleno = 20 (0x14), region = 64 }
   0xe   : > { %s1026_s16 = sshll.u32 %s1428_s15, 3  ;;  %s1030_s17 = sshll.u32 %s1428_s15, 2  ;;  %vm397_vm0 = vcmask (!%p1031_p4), 261120   ;;  %v1208_v0 = vmov (!%p1031_p4), 0.0  }
   0xf   : > { %s378_s20 = scalar_lea.vmem %s1416_s0, %s1026_s16  ;;  %s1289_s23 = scalar_lea.vmem %s1417_s1, %s1026_s16  ;;  %398 = vst.msk [vmem:[#allocation2] sm:$0xff] (!%p1031_p4), %vm397_vm0, %v1208_v0  ;;  %399 = vst.msk [vmem:[#allocation2 + $0x8] sm:$0xff] (!%p1031_p4), %vm397_vm0, %v1208_v0 }
  0x10   : > { %s390_s26 = scalar_lea.vmem %s1418_s2, %s1030_s17 }
  0x14 PF: > { %v476_v1 = vld [vmem:[%s378_s20] sm:$0xff]  ;;  %vm417_vm1 = vcmask 1042432   ;;  %vm418_vm2 = vcmask 1043456   ;;  %v1209_v3 = vmov 0   ;;  %v477_v6 = vld [vmem:[%s378_s20 + $0x8] sm:$0xff]  ;;  %v1210_v7 = vmov 65535  }
  0x15   : > { %v402_v2 = vld [vmem:[%s1420_s4] sm:$0xff]  ;;  %1143 = vset.pattern.permute.xlu0 %v1209_v3  ;;  %459 = vmatprep.mubr.bf16.mxu1 %v1209_v3  ;;  %v419_v8 = vsel %vm417_vm1, 4294967295, %v1210_v7  ;;  %vm413_vm3 = vcmask 56320   ;;  %v1153_v17 = vld [vmem:[%s1421_s5 + $0x48] sm:$0xff]   ;;  %v1155_v19 = vld [vmem:[%s1421_s5 + $0x50] sm:$0xff]   ;;  %v1211_v20 = vmov 0.0   ;;  %v474_v30 = vlaneseq }
  0x16   : > { %v1034_v4 = vcombine.high %v402_v2, %v402_v2  ;;  %v1033_v5 = vcombine.low %v402_v2, %v402_v2  ;;  %479 = vperm.xlu0 %1143, %v476_v1   ;;  %1144 = vset.pattern.permute.xlu1 %v1209_v3  ;;  %v420_v9 = vsel %vm418_vm2, %v419_v8, 0  ;;  %v1147_v12 = vld [vmem:[%s390_s26] sm:$0xff]   ;;  %v1154_v18 = vld [vmem:[%s1421_s5 + $0x8] sm:$0xff]   ;;  %v1156_v21 = vld [vmem:[%s1421_s5 + $0x10] sm:$0xff]   ;;  %vm518_vm6 = vcmask 130048   ;;  %p1060_p5 = scmp.ne.s32.totalorder %s1278_s14, 1 }
  0x17   : > { %v1150_v13 = vld [vmem:[%s1419_s3 + $0x4] ss:$8 sps:$4 sm:$0xff]   ;;  %v1148_v14 = vld [vmem:[%s1419_s3] ss:$8 sps:$4 sm:$0xff]   ;;  %v1157_v22 = vld [vmem:[%s1421_s5 + $0x58] sm:$0xff]   ;;  %v475_v31 = vand.u32 127, %v474_v30 }
  0x18   : > { %v425_v10 = vand.u32 %v1034_v4, %v420_v9  ;;  %v422_v11 = vand.u32 %v1033_v5, %v420_v9  ;;  %v1151_v15 = vld [vmem:[%s1421_s5 + $0x40] sm:$0xff]   ;;  %v1158_v23 = vld [vmem:[%s1421_s5 + $0x18] sm:$0xff]   ;;  %v1161_v27 = vld [vmem:[%s1421_s5 + $0x68] sm:$0xff]   ;;  %vm1212_vm9 = vmmov 0   ;;  %vm805_vm10 = vcmask 261120  }
  0x19   : > { %v1152_v16 = vld [vmem:[%s1421_s5] sm:$0xff]   ;;  %1071 = vmatprep.subr.bf16.mxu0 %v1151_v15  ;;  %v492_v28 = vld [vmem:[%s1289_s23 + $0x8] sm:$0xff]  ;;  %v1163_v37 = vld [vmem:[%s1421_s5 + $0x70] sm:$0xff]   ;;  %vm1214_vm11 = vmmov (!%p1060_p5), 0   ;;  %vm949_vm13 = vcmask (!%p1060_p5), 58368  }
  0x1a   : > { %482 = vperm.xlu0 %1143, %v477_v6   ;;  %427 = vmatprep.subr.bf16.mxu1 %v425_v10  ;;  %v1159_v24 = vld [vmem:[%s1421_s5 + $0x60] sm:$0xff]   ;;  %v1162_v29 = vld [vmem:[%s1421_s5 + $0x28] sm:$0xff]   ;;  %v1164_v39 = vld [vmem:[%s1421_s5 + $0x30] sm:$0xff]  }
  0x1b   : > { %428 = vmatpush1.bf16.msra.mxu1 %v422_v11  ;;  %1072 = vmatpush3.bf16.msra.mxu0 %v1152_v16  ;;  %v491_v25 = vld [vmem:[%s1289_s23] sm:$0xff]  ;;  %v1165_v43 = vld [vmem:[%s1421_s5 + $0x78] sm:$0xff]   ;;  %v742_v10 = vld [vmem:[#allocation2 + $0x8] sm:$0xff] }
  0x1c   : > { %522 = vmatprep.subr.bf16.mxu1 %v1150_v13  ;;  %1073 = vmatprep.subr.bf16.mxu0 %v1153_v17  ;;  %v1160_v26 = vld [vmem:[%s1421_s5 + $0x20] sm:$0xff]   ;;  %v1166_v44 = vld [vmem:[%s1421_s5 + $0x38] sm:$0xff]  }
  0x1d   : > { %494 = vperm.xlu1 %1144, %v491_v25   ;;  %v741_v8 = vld [vmem:[#allocation2] sm:$0xff] }
  0x1e   : > { %1035 = vmatmul.mubr.msk.bf16.vlgmr.msra.gmra.mrb[0].mxu1 %vm413_vm3, %v1147_v12 }
  0x1f   : > { %523 = vmatpush1.bf16.msra.mxu1 %v1148_v14  ;;  %554 = vmatprep.mubr.bf16.mxu1 %v1209_v3 }
  0x20   : > { %1100 = vmatprep.subr.bf16.mxu1 %v1211_v20  ;;  %1074 = vmatpush3.bf16.msra.mxu0 %v1154_v18  ;;  %v814_v18 = vld [vmem:[%s1422_s6] sm:$0xff] (!%p1060_p5) }
  0x21   : > { %1075 = vmatprep.subr.bf16.mxu0 %v1155_v19  ;;  %497 = vperm.xlu1 %1144, %v492_v28   ;;  %v821_v19 = vshrl.u32 (!%p1060_p5), %v474_v30, 7 }
  0x24   : > { %1076 = vmatpush3.bf16.msra.mxu0 %v1156_v21  ;;  %v815_v21 = vld [vmem:[%s1422_s6 + $0x8] sm:$0xff] (!%p1060_p5) }
  0x25   : > { %1077 = vmatprep.subr.bf16.mxu0 %v1157_v22 }
  0x28   : > { %1078 = vmatpush3.bf16.msra.mxu0 %v1158_v23  ;;  %v1061_v23 = vld [vmem:[%s1423_s7] ss:$0 sm:$0xff] (!%p1060_p5) }
  0x29   : > { %1079 = vmatprep.subr.bf16.mxu0 %v1159_v24  ;;  %v875_v24 = vld [vmem:[%s1424_s8] sm:$0x3] (!%p1060_p5)  ;;  %vm827_vm12 = vcmp.eq.s32.totalorder (!%p1060_p5), %v821_v19, %v1061_v23 }
  0x2c   : > { %1080 = vmatpush3.bf16.msra.mxu0 %v1160_v26  ;;  %v1215_v26 = vmov (!%p1060_p5), 0  }
  0x2d   : > { %1081 = vmatprep.subr.bf16.mxu0 %v1161_v27 }
  0x30   : > { %1082 = vmatpush3.bf16.msra.mxu0 %v1162_v29 }
  0x31   : > { %1083 = vmatprep.subr.bf16.mxu0 %v1163_v37 }
  0x34   : > { %1084 = vmatpush3.bf16.msra.mxu0 %v1164_v39 }
  0x35   : > { %1085 = vmatprep.subr.bf16.mxu0 %v1165_v43 }
  0x38   : > { %1086 = vmatpush3.bf16.msra.mxu0 %v1166_v44  ;;  %v892_v44 = vsub.s32 (!%p1060_p5), 0, %v821_v19 }
  0x95   : > { %v480_v32 = vpop.permute.xlu0 %479 }
  0x96   : > { %vm484_vm4 = vcmp.eq.s32.totalorder %v475_v31, %v480_v32  ;;  %v1168_v32 = vld [vmem:[%s1425_s9] sm:$0xff] (!%p1060_p5)  }
  0x97   : > { %v1036_v34 = vsel %vm484_vm4, 1.0, %v1211_v20 }
  0x99   : > { %v483_v33 = vpop.permute.xlu0 %482 }
  0x9a   : > { %vm485_vm5 = vcmp.eq.s32.totalorder %v475_v31, %v483_v33  ;;  %v1169_v33 = vld [vmem:[%s1425_s9 + $0x8] sm:$0xff] (!%p1060_p5)  }
  0x9b   : > { %v1037_v35 = vsel %vm485_vm5, 1.0, %v1211_v20 }
  0x9c   : > { %v490_v36 = vpack.c.bf16 %v1037_v35, %v1036_v34  ;;  %v495_v45 = vpop.permute.xlu1 %494 }
  0x9d   : > { %vm499_vm7 = vcmp.eq.s32.totalorder %v475_v31, %v495_v45 }
  0x9e   : > { %1042 = vmatmul.mubr.msk.bf16.vlgmr.msra.gmra.mrb[4].mxu1 %vm518_vm6, %v490_v36  ;;  %v1038_v46 = vsel %vm499_vm7, 1.0, %v1211_v20 }
  0x9f   : > { %1102 = vmatprep.mubr.msk.bf16.mxu1 %vm1212_vm9, %v1211_v20 }
  0xa0   : > { %v498_v47 = vpop.permute.xlu1 %497 }
  0xa1   : > { %vm500_vm8 = vcmp.eq.s32.totalorder %v475_v31, %v498_v47 }
  0xa2   : > { %v1039_v48 = vsel %vm500_vm8, 1.0, %v1211_v20  ;;  %v1213_v20 = vmov (!%p1060_p5), 0.0  }
  0xa3   : > { %v505_v49 = vpack.c.bf16 %v1039_v48, %v1038_v46  ;;  %1106 = vmatprep.subr.bf16.mxu0 (!%p1060_p5), %v1213_v20  ;;  %v1062_v29 = vsel (!%p1060_p5), %vm827_vm12, 1.0, %v1213_v20 }
  0xa4   : > { %v830_v31 = vpack.c.bf16 (!%p1060_p5), %v1062_v29, %v1062_v29 }
  0xa5   : > { %743 = vxpose.xlu0.c.b16.start.end [1/1] (short) (narrow) %v505_v49, 16 }
  0xae   : > { %1167 = vset.pattern.permute.xlu0 (!%p1060_p5), %v1215_v26 }
  0xaf   : > { %878 = vperm.xlu0 (!%p1060_p5), %1167, %v875_v24  }
  0xf1   : > { %v461_v38 = vpop.f32.mrb[0].mxu1 }
  0xf2   : > { %v463_v40 = vpop.f32.mrb[1].mxu1  ;;  %v470_v50 = vmax.f32 %v461_v38, 0.0 }
  0xf3   : > { %v465_v41 = vpop.f32.mrb[2].mxu1  ;;  %v471_v51 = vmax.f32 %v463_v40, 0.0 }
  0xf4   : > { %v467_v42 = vpop.f32.mrb[3].mxu1  ;;  %v472_v53 = vmax.f32 %v465_v41, 0.0 }
  0xf5   : > { %v473_v56 = vmax.f32 %v467_v42, 0.0  ;;  %v886_v42 = vld [vmem:[%s1425_s9 + $0x10] sm:$0x1] (!%p1060_p5) }
  0xf6   : > { %v889_v43 = vunpack.c.l.bf16 (!%p1060_p5), %v886_v42 }
  0xf8   : > { %v893_v45 = vrot.slane (!%p1060_p5), %v889_v43, %v892_v44 }
 0x10b   : > { %v751_v7 = vpop.trf.xlu0 }
 0x12e   : > { %v879_v34 = vpop.permute.xlu0 (!%p1060_p5), %878 }
 0x171   : > { %v556_v52 = vpop.f32.mrb[4].mxu1 }
 0x172   : > { %v565_v54 = vmul.f32 %v556_v52, %v470_v50  ;;  %v558_v55 = vpop.f32.mrb[5].mxu1 }
 0x173   : > { %v566_v57 = vmul.f32 %v558_v55, %v471_v51  ;;  %v560_v58 = vpop.f32.mrb[6].mxu1 }
 0x174   : > { %v567_v59 = vmul.f32 %v560_v58, %v472_v53  ;;  %v562_v60 = vpop.f32.mrb[7].mxu1 }
 0x175   : > { %v568_v61 = vmul.f32 %v562_v60, %v473_v56 }
 0x176   : > { %v569_v62 = vpack.c.bf16 %v567_v59, %v565_v54 }
 0x177   : > { %v570_v63 = vpack.c.bf16 %v568_v61, %v566_v57 }
 0x179   : > { %731 = vmatprep.mubr.bf16.mxu0 %v570_v63 }
 0x17a   : > { %732 = vmatmul.mubr.bf16.vlgmr.msra.gmra.mrb[0].mxu0 %v569_v62 }
 0x17b   : > { %1108 = vmatprep.mubr.msk.bf16.mxu0 (!%p1060_p5), %vm1214_vm11, %v1213_v20 }
 0x24d   : > { %v1087_v0 = vpop.f32.mrb[0].mxu0 }
 0x24e   : > { %v1088_v1 = vpop.f32.mrb[1].mxu0 }
 0x24f   : > { %v1089_v2 = vadd.f32 %v1088_v1, %v1087_v0  ;;  %v1090_v3 = vpop.f32.mrb[2].mxu0 }
 0x250   : > { %v1091_v4 = vpop.f32.mrb[3].mxu0 }
 0x251   : > { %v1092_v5 = vadd.f32 %v1091_v4, %v1090_v3 }
 0x253   : > { %v740_v6 = vpack.c.bf16 %v1092_v5, %v1089_v2 }
 0x255   : > { %1101 = vmatpush3.bf16.msra.mxu1 %v740_v6 }
 0x256   : > { %1112 = vmatprep.subr.bf16.mxu1 (!%p1060_p5), %v1213_v20 }
 0x258   : > { %1103 = vmatmul.mubr.msk.bf16.vlgmr.msra.gmra.mrb[8].mxu1 %vm518_vm6, %v751_v7 }
 0x259   : > { %1116 = vmatprep.mubr.msk.bf16.mxu1 (!%p1060_p5), %vm1214_vm11, %v1213_v20  ;;  %1113 = vmatpush3.bf16.msra.mxu1 (!%p1060_p5), %v1168_v32 }
 0x25a   : > { %1114 = vmatprep.subr.bf16.mxu1 (!%p1060_p5), %v1213_v20 }
 0x25d   : > { %1115 = vmatpush3.bf16.msra.mxu1 (!%p1060_p5), %v1169_v33 }
 0x32a   : > { %811 = sbr.rel (%p1060_p5) target bundleno = 1266 (0x4f2), region = 68 }
 0x32b   : > { %v796_v9 = vpop.f32.mrb[8].mxu1 }
 0x32c   : > { %v803_v11 = vadd.f32 %v796_v9, %v741_v8  ;;  %v1104_v12 = vpop.f32.mrb[9].mxu1 }
 0x32d   : > { %v799_v13 = vpop.f32.mrb[10].mxu1 }
 0x32e   : > { %806 = vst.msk [vmem:[#allocation2] sm:$0xff] %vm805_vm10, %v803_v11  ;;  %v804_v14 = vadd.f32 %v799_v13, %v742_v10  ;;  %v1105_v15 = vpop.f32.mrb[11].mxu1 }
 0x330   : > { %807 = vst.msk [vmem:[#allocation2 + $0x8] sm:$0xff] %vm805_vm10, %v804_v14 }
 0x335   : > { %v812_v16 = vld [vmem:[#allocation2] sm:$0xff] }
 0x336   : > { %v816_v22 = vadd.f32 %v814_v18, %v812_v16 }
 0x337   : > { %v813_v17 = vld [vmem:[#allocation2 + $0x8] sm:$0xff] }
 0x338   : > { %v817_v25 = vadd.f32 %v815_v21, %v813_v17  ;;  %v818_v27 = vmax.f32 %v816_v22, 0.0 }
 0x33a   : > { %v819_v28 = vmax.f32 %v817_v25, 0.0 }
 0x33c   : > { %v831_v30 = vpack.c.bf16 %v819_v28, %v818_v27 }
 0x33e   : > { %1107 = vmatpush3.bf16.msra.mxu0 %v831_v30 }
 0x341   : > { %1109 = vmatmul.mubr.msk.bf16.vlgmr.msra.gmra.mrb[0].mxu0 %vm518_vm6, %v830_v31 }
 0x414   : > { %v869_v35 = vpop.f32.mrb[0].mxu0 }
 0x415   : > { %v881_v36 = vmul.f32 %v879_v34, %v869_v35  ;;  %v1110_v37 = vpop.f32.mrb[1].mxu0 }
 0x416   : > { %v872_v38 = vpop.f32.mrb[2].mxu0 }
 0x417   : > { %v887_v39 = vmax.f32 %v881_v36, 0.0  ;;  %v1111_v40 = vpop.f32.mrb[3].mxu0 }
 0x419   : > { %v888_v41 = vpack.c.bf16 %v887_v39, %v887_v39 }
 0x41b   : > { %1117 = vmatmul.mubr.msk.bf16.vlgmr.msra.gmra.mrb[0].mxu1 %vm805_vm10, %v888_v41 }
 0x4ee   : > { %v943_v46 = vpop.f32.mrb[0].mxu1 }
 0x4ef   : > { %v944_v47 = vadd.f32 %v943_v46, %v893_v45  ;;  %v1118_v48 = vpop.f32.mrb[1].mxu1 }
 0x4f0   : > { %v946_v49 = vpop.f32.mrb[2].mxu1 }
 0x4f1   : > { %950 = vst.msk [vmem:[#allocation3] sm:$0x3] %vm949_vm13, %v944_v47  ;;  %v1119_v50 = vpop.f32.mrb[3].mxu1 }
 0x4f2 PF: > { %p1124_p6 = scmp.eq.s32.totalorder %s1278_s14, 1  ;;  %s1216_s26 = smov [#allocation3]  }
 0x4f3   : > { %s958_s27 = sshll.u32 %s1216_s26, 4  ;;  %s959_s27 = int_to_ptr.vmem [resolvable:$true] %s958_s27 }
 0x4f4   : > { %s1170_s28 = scalar_lea.vmem %s959_s27, 32  ;;  %p1177_p10 = scmp.lt.s32.totalorder %s959_s27, %s959_s27 }
 0x4f5   : > { %p1171_p7 = scmp.ne.s32.totalorder %s959_s27, %s1170_s28  ;;  %p1178_p11 = scmp.lt.s32.totalorder %s1170_s28, %s1170_s28 }
 0x4f7   : > { %p1172_p8 = pnand %p1171_p7, %p1124_p6  ;;  %p1179_p12 = por %p1178_p11, %p1177_p10 }
 0x4f9   : > { %p1173_p9 = pneg %p1172_p8 }
 0x4fb   : > { %p1180_p13 = pnand %p1179_p12, %p1173_p9 }
 0x4fd   : > { %1183 = shalt.err (!%p1180_p13)
}
 0x4fe   : > { %s1184_s11 = scalar_lea.hbm %s1426_s10, 32 }
 0x4ff   : > { %p1185_p0 = scmp.ne.s32.totalorder %s1426_s10, %s1184_s11  ;;  %p1190_p3 = scmp.lt.u32.totalorder %s1184_s11, %s1426_s10 }
 0x501   : > { %p1186_p1 = pnand %p1185_p0, %p1124_p6 }
 0x503   : > { %p1187_p2 = pneg %p1186_p1 }
 0x505   : > { %p1192_p4 = pnand %p1190_p3, %p1187_p2 }
 0x507   : > { %1195 = shalt.err (!%p1192_p4)
}
 0x508   : > { %1121 = dma.vmem_to_hbm [thread:$0]  (%p1124_p6), %s959_s27, 32, %s1426_s10, [#allocation4]  }
 0x509   : > { %1201 = dma.done.wait (%p1124_p6), [#allocation4], 32  }
 0x50a   : > { %1203 = vsyncadd (%p1124_p6), [#allocation4], 4294967264 }
 0x50b PF: > { %s21_s13 = sadd.s32 1, %s1206_s13  }
 0x50c   : > { %p18_p5 = scmp.ge.s32.totalorder %s21_s13, 4  }
 0x50e   :  { %20 = sbr.rel (!%p18_p5) target bundleno = 1 (0x1), region = 101 }
 0x515   :  { %971 = vsyncpa [#allocation4], 1 }
 0x516   :  { %973 = vsyncpa [#allocation4 + $0x1], 1 }

</bundles_post_ra>
